<compile_context>
chip_gen: v7x
topology: tpu7x:2x2x1
jax: 0.10.0
libtpu: 0.0.40
codegen_flags: <defaults>
</compile_context>

<pallas_src>
import numpy as np
import jax
import jax.numpy as jnp
from jax.experimental import pallas as pl
from jax.experimental.pallas import tpu as pltpu


def _round_up(x, m):
    return ((x + m - 1) // m) * m


def _choose_mblk(m_rows):
    """MXU-friendly M tile; prefer >=2 grid steps so both v7x TensorCores work."""
    if m_rows > 256:
        return 256
    half = _round_up(max(1, -(-m_rows // 2)), 16)
    return max(16, half)


# ----------------------------- Pallas kernel ------------------------------ #
def temporal_kernel(x_ref, w1_ref, shift_ref, w2_ref, b2_ref, o_ref):
    # x_ref:     (Mblk, Kp)   bf16   im2col rows (batch*time flattened)
    # w1_ref:    (Kp, Cp)     bf16   expand conv weights with BN scale folded in
    # shift_ref: (1, Cp)      f32    folded bias: b_expand*bn_scale + bn_shift
    # w2_ref:    (Cp, Cop)    bf16   shrink 1x1 conv weights
    # b2_ref:    (1, Cop)     f32    shrink bias
    # o_ref:     (Mblk, Cop)  f32    lane-dense (128-multiple) output tile
    h = jnp.dot(x_ref[...], w1_ref[...], preferred_element_type=jnp.float32)
    h = jnp.maximum(h + shift_ref[...], 0.0)          # BN+bias folded; ReLU
    out = jnp.dot(h.astype(jnp.bfloat16), w2_ref[...],
                  preferred_element_type=jnp.float32)
    o_ref[...] = (out + b2_ref[...]).astype(o_ref.dtype)


# ------------------------------ Wrapper ----------------------------------- #
def temporal_model_forward(x, params, *, num_joints_in, in_features,
                           num_joints_out, filter_width):
    assert x.ndim == 4
    assert x.shape[-2] == num_joints_in
    assert x.shape[-1] == in_features
    assert filter_width % 2 == 1, "Only odd filter widths are supported"

    B, T, J, F = x.shape
    Cin = J * F
    fw = filter_width
    pad = fw // 2
    T_out = T - 2 * pad
    C = params["w_expand"].shape[2]
    Cout = params["w_shrink"].shape[1]          # num_joints_out * 3

    # ---- host-side folding: BN (eval) + expand bias into matmul weights ----
    bn_scale = params["bn_scale"]                               # (1, C)
    w1 = params["w_expand"].reshape(fw * Cin, C) * bn_scale     # (fw*Cin, C)
    shift1 = params["b_expand"] * bn_scale + params["bn_shift"]  # (1, C)
    w2 = params["w_shrink"]                                     # (C, Cout)
    b2 = params["b_shrink"]                                     # (1, Cout)

    # ---- host-side im2col: one fused MXU matmul, no unaligned slices ----
    xf = x.reshape(B, T, Cin).astype(jnp.float32)
    cols = jnp.concatenate([xf[:, k:k + T_out, :] for k in range(fw)], axis=-1)
    x_col = cols.reshape(B * T_out, fw * Cin)                   # (M, fw*Cin)

    # ---- lane/sublane friendly zero-padding ----
    K = fw * Cin
    Kp = _round_up(K, 128)
    Cp = _round_up(C, 128)
    Cop = _round_up(Cout, 128)
    M = B * T_out
    Mblk = _choose_mblk(M)
    Mpad = _round_up(M, Mblk)

    x_col = jnp.pad(x_col, ((0, Mpad - M), (0, Kp - K))).astype(jnp.bfloat16)
    w1p = jnp.pad(w1, ((0, Kp - K), (0, Cp - C))).astype(jnp.bfloat16)
    s1p = jnp.pad(shift1, ((0, 0), (0, Cp - C))).astype(jnp.float32)
    w2p = jnp.pad(w2, ((0, Cp - C), (0, Cop - Cout))).astype(jnp.bfloat16)
    b2p = jnp.pad(b2, ((0, 0), (0, Cop - Cout))).astype(jnp.float32)

    n_m = Mpad // Mblk
    flops = 2 * Mpad * Kp * Cp + 2 * Mpad * Cp * Cop
    bytes_accessed = (x_col.size * 2 + w1p.size * 2 + w2p.size * 2
                      + s1p.size * 4 + b2p.size * 4 + Mpad * Cop * 4)

    out = pl.pallas_call(
        temporal_kernel,
        out_shape=jax.ShapeDtypeStruct((Mpad, Cop), jnp.float32),
        grid_spec=pltpu.PrefetchScalarGridSpec(
            num_scalar_prefetch=0,
            grid=(n_m,),
            in_specs=[
                pl.BlockSpec((Mblk, Kp), lambda m: (m, 0)),   # x im2col tile
                pl.BlockSpec((Kp, Cp), lambda m: (0, 0)),     # W1 (resident)
                pl.BlockSpec((1, Cp), lambda m: (0, 0)),      # folded shift
                pl.BlockSpec((Cp, Cop), lambda m: (0, 0)),    # W2 (resident)
                pl.BlockSpec((1, Cop), lambda m: (0, 0)),     # shrink bias
            ],
            out_specs=pl.BlockSpec((Mblk, Cop), lambda m: (m, 0)),
        ),
        compiler_params=pltpu.CompilerParams(
            dimension_semantics=("parallel",)),
        cost_estimate=pl.CostEstimate(flops=flops, transcendentals=0,
                                      bytes_accessed=bytes_accessed),
    )(x_col, w1p, s1p, w2p, b2p)

    # strip padding; permute/view back to (B, T_out, num_joints_out, 3)
    return out[:M, :Cout].reshape(B, T_out, num_joints_out, 3)


# ------------------------- Pure-JAX reference ------------------------------ #
def reference_forward(x, params, *, num_joints_out, filter_width):
    B, T, J, F = x.shape
    Cin = J * F
    pad = filter_width // 2
    T_out = T - 2 * pad
    xf = x.reshape(B, T, Cin).astype(jnp.float32)
    C = params["w_expand"].shape[2]
    acc = jnp.zeros((B, T_out, C), jnp.float32)
    for k in range(filter_width):
        acc = acc + jnp.einsum("btc,cd->btd", xf[:, k:k + T_out, :],
                               params["w_expand"][k])
    h = acc + params["b_expand"]
    h = h * params["bn_scale"] + params["bn_shift"]
    h = jnp.maximum(h, 0.0)
    out = jnp.einsum("btc,cd->btd", h, params["w_shrink"]) + params["b_shrink"]
    return out.reshape(B, T_out, num_joints_out, 3)


# --------------------------------- Main ------------------------------------ #
if __name__ == "__main__":
    # Small, module-consistent shapes.
    B, T = 2, 16
    num_joints_in, in_features = 4, 2        # Cin = 8
    num_joints_out = 4                        # Cout = 12
    channels = 32
    filter_width = 3                          # odd, as the module asserts
    Cin = num_joints_in * in_features
    Cout = num_joints_out * 3

    key = jax.random.PRNGKey(0)
    k1, k2, k3, k4, k5, k6, k7, k8 = jax.random.split(key, 8)

    # Deterministic synthetic parameters (shapes follow nn.Conv1d / BatchNorm1d).
    w_expand = 0.1 * jax.random.normal(k1, (filter_width, Cin, channels), jnp.float32)
    b_expand = 0.1 * jax.random.normal(k2, (1, channels), jnp.float32)
    gamma = 1.0 + 0.1 * jax.random.normal(k3, (channels,), jnp.float32)
    beta = 0.1 * jax.random.normal(k4, (channels,), jnp.float32)
    running_mean = 0.1 * jax.random.normal(k5, (channels,), jnp.float32)
    running_var = jnp.abs(jax.random.normal(k6, (channels,), jnp.float32)) + 0.5
    eps = 1e-5
    bn_scale = (gamma / jnp.sqrt(running_var + eps)).reshape(1, channels)
    bn_shift = (beta - running_mean * gamma / jnp.sqrt(running_var + eps)).reshape(1, channels)
    w_shrink = 0.1 * jax.random.normal(k7, (channels, Cout), jnp.float32)
    b_shrink = 0.1 * jax.random.normal(k8, (1, Cout), jnp.float32)

    params = dict(w_expand=w_expand, b_expand=b_expand,
                  bn_scale=bn_scale, bn_shift=bn_shift,
                  w_shrink=w_shrink, b_shrink=b_shrink)

    x = jax.random.normal(jax.random.PRNGKey(42),
                          (B, T, num_joints_in, in_features), jnp.float32)

    y = temporal_model_forward(
        x, params,
        num_joints_in=num_joints_in, in_features=in_features,
        num_joints_out=num_joints_out, filter_width=filter_width)
    y = jax.block_until_ready(y)

    y_ref = reference_forward(x, params, num_joints_out=num_joints_out,
                              filter_width=filter_width)
    y_ref = jax.block_until_ready(y_ref)

    assert y.shape == (B, T - 2 * (filter_width // 2), num_joints_out, 3), y.shape
    # bf16 MXU operands (f32 accumulation) -> loosened tolerance vs f32 reference.
    np.testing.assert_allclose(np.asarray(y), np.asarray(y_ref), rtol=2e-2, atol=2e-2)
    print("KERNEL_OK")
</pallas_src>

<mosaic_0001>
module attributes {stable_mosaic.version = 11 : i64} {
  func.func @temporal_kernel(%arg0: i32, %arg1: memref<16x128xbf16, #tpu.memory_space<vmem>>, %arg2: memref<128x128xbf16, #tpu.memory_space<vmem>>, %arg3: memref<1x128xf32, #tpu.memory_space<vmem>>, %arg4: memref<128x128xbf16, #tpu.memory_space<vmem>>, %arg5: memref<1x128xf32, #tpu.memory_space<vmem>>, %arg6: memref<16x128xf32, #tpu.memory_space<vmem>>) attributes {dimension_semantics = [#tpu.dimension_semantics<parallel>], iteration_bounds = array<i64: 2>, scalar_prefetch = 0 : i64, scratch_operands = 0 : i64, tpu.core_type = #tpu.core_type<tc>, window_params = [{transform_indices = @transform_0, window_bounds = array<i64: 16, 128>}, {pipeline_mode = #tpu.pipeline_mode<synchronous>, transform_indices = @transform_1, window_bounds = array<i64: 128, 128>}, {pipeline_mode = #tpu.pipeline_mode<synchronous>, transform_indices = @transform_2, window_bounds = array<i64: 1, 128>}, {pipeline_mode = #tpu.pipeline_mode<synchronous>, transform_indices = @transform_3, window_bounds = array<i64: 128, 128>}, {pipeline_mode = #tpu.pipeline_mode<synchronous>, transform_indices = @transform_4, window_bounds = array<i64: 1, 128>}, {transform_indices = @transform_5, window_bounds = array<i64: 16, 128>}]} {
    %c0 = arith.constant 0 : index
    %c0_0 = arith.constant 0 : index
    %0 = vector.load %arg1[%c0, %c0_0] : memref<16x128xbf16, #tpu.memory_space<vmem>>, vector<16x128xbf16>
    %c0_1 = arith.constant 0 : index
    %c0_2 = arith.constant 0 : index
    %1 = vector.load %arg2[%c0_1, %c0_2] : memref<128x128xbf16, #tpu.memory_space<vmem>>, vector<128x128xbf16>
    %cst = arith.constant dense<0.000000e+00> : vector<16x128xf32>
    %2 = tpu.matmul %0, %1, %cst {dimension_numbers = #tpu.dot_dimension_numbers<[1], [0], [0], [1], [0, 0, 1, 1], [], []>} : vector<16x128xbf16>, vector<128x128xbf16>, vector<16x128xf32> -> vector<16x128xf32>
    %c0_3 = arith.constant 0 : index
    %c0_4 = arith.constant 0 : index
    %3 = vector.load %arg3[%c0_3, %c0_4] : memref<1x128xf32, #tpu.memory_space<vmem>>, vector<1x128xf32>
    %4 = vector.broadcast %3 : vector<1x128xf32> to vector<16x128xf32>
    %5 = arith.addf %2, %4 : vector<16x128xf32>
    %cst_5 = arith.constant 0.000000e+00 : f32
    %6 = vector.broadcast %cst_5 : f32 to vector<16x128xf32>
    %7 = arith.maximumf %5, %6 : vector<16x128xf32>
    %8 = arith.truncf %7 : vector<16x128xf32> to vector<16x128xbf16>
    %c0_6 = arith.constant 0 : index
    %c0_7 = arith.constant 0 : index
    %9 = vector.load %arg4[%c0_6, %c0_7] : memref<128x128xbf16, #tpu.memory_space<vmem>>, vector<128x128xbf16>
    %cst_8 = arith.constant dense<0.000000e+00> : vector<16x128xf32>
    %10 = tpu.matmul %8, %9, %cst_8 {dimension_numbers = #tpu.dot_dimension_numbers<[1], [0], [0], [1], [0, 0, 1, 1], [], []>} : vector<16x128xbf16>, vector<128x128xbf16>, vector<16x128xf32> -> vector<16x128xf32>
    %c0_9 = arith.constant 0 : index
    %c0_10 = arith.constant 0 : index
    %11 = vector.load %arg5[%c0_9, %c0_10] : memref<1x128xf32, #tpu.memory_space<vmem>>, vector<1x128xf32>
    %12 = vector.broadcast %11 : vector<1x128xf32> to vector<16x128xf32>
    %13 = arith.addf %10, %12 : vector<16x128xf32>
    %c0_11 = arith.constant 0 : index
    %c0_12 = arith.constant 0 : index
    %14 = vector.load %arg6[%c0_11, %c0_12] : memref<16x128xf32, #tpu.memory_space<vmem>>, vector<16x128xf32>
    tpu.vector_store %arg6[%c0_11, %c0_12], %13 {strides = array<i32>} : memref<16x128xf32, #tpu.memory_space<vmem>>, vector<16x128xf32>,
    return
  }
  func.func @transform_0(%arg0: i32) -> (i32, i32) {
    %c0_i32 = arith.constant 0 : i32
    %c0_i32_0 = arith.constant 0 : i32
    return %arg0, %c0_i32 : i32, i32
  }
  func.func @transform_1(%arg0: i32) -> (i32, i32) {
    %c0_i32 = arith.constant 0 : i32
    %c0_i32_0 = arith.constant 0 : i32
    %c0_i32_1 = arith.constant 0 : i32
    return %c0_i32, %c0_i32_0 : i32, i32
  }
  func.func @transform_2(%arg0: i32) -> (i32, i32) {
    %c0_i32 = arith.constant 0 : i32
    %c0_i32_0 = arith.constant 0 : i32
    %c0_i32_1 = arith.constant 0 : i32
    return %c0_i32, %c0_i32_0 : i32, i32
  }
  func.func @transform_3(%arg0: i32) -> (i32, i32) {
    %c0_i32 = arith.constant 0 : i32
    %c0_i32_0 = arith.constant 0 : i32
    %c0_i32_1 = arith.constant 0 : i32
    return %c0_i32, %c0_i32_0 : i32, i32
  }
  func.func @transform_4(%arg0: i32) -> (i32, i32) {
    %c0_i32 = arith.constant 0 : i32
    %c0_i32_0 = arith.constant 0 : i32
    %c0_i32_1 = arith.constant 0 : i32
    return %c0_i32, %c0_i32_0 : i32, i32
  }
  func.func @transform_5(%arg0: i32) -> (i32, i32) {
    %c0_i32 = arith.constant 0 : i32
    %c0_i32_0 = arith.constant 0 : i32
    return %arg0, %c0_i32 : i32, i32
  }
}

</mosaic_0001>

<bundles_post_ra>
// kernel: tpu_custom_call.1
= control target key start
LH: loop header
LB: loop body
LE: loop exit
PB: predicated region body
PF: predicated region fallthrough
CT: control target
= control target key end

     0   :  { %10 = vsyncpa [#allocation3], 0  ;;  %s1256_s0 = inlined_call_operand.hbm [shape: bf16[32,128], index: 0, kind: input, shape index: {}]   ;;  %s1257_s1 = inlined_call_operand.hbm [shape: bf16[128,128], index: 1, kind: input, shape index: {}]   ;;  %s1258_s2 = inlined_call_operand.vmem [shape: f32[1,128], index: 2, kind: input, shape index: {}]   ;;  %s1259_s3 = inlined_call_operand.hbm [shape: bf16[128,128], index: 3, kind: input, shape index: {}]   ;;  %s1260_s4 = inlined_call_operand.vmem [shape: f32[1,128], index: 4, kind: input, shape index: {}]   ;;  %s1261_s5 = inlined_call_operand.hbm [shape: f32[32,128], index: 5, kind: output, shape index: {}]  }
   0x1   :  { %12 = vsyncpa [#allocation3 + $0x1], 0 }
   0x2   :  { %13 = vsyncpa [#allocation6], 0 }
   0x3   :  { %14 = vsyncpa [#allocation4], 0 }
   0x4   :  { %16 = vsyncpa [#allocation4 + $0x1], 0  ;;  %s1003_s18 = smov 0   ;;  %s1005_s19 = smov 0  }
   0x5   :  { %s1007_s20 = smov 0   ;;  %s1009_s21 = smov 0  }
   0x6 LB: > { %s1024_s22 = sadd.s32 4294967295, %s961_s21   ;;  %s618_s23 = sadd.s32 4294967294, %s961_s21   ;;  %s961_s21 = sphi %s1009_s21, %s1281_s21   ;;  %s957_s20 = sphi %s1007_s20, %s1280_s20   ;;  %s953_s19 = sphi %s1005_s19, %s1279_s19   ;;  %s949_s18 = sphi %s1003_s18, %s1278_s18  }
   0x7   : > { %p42_p0 = scmp.ne.s32.totalorder %s953_s19, %s949_s18  ;;  %p1262_p1 = scmp.eq.s32.totalorder %s1024_s22, 0 }
   0x8   : > { %p156_p3 = scmp.eq.s32.totalorder %s618_s23, 1  ;;  %p619_p5 = scmp.ge.s32.totalorder %s961_s21, 1 }
   0x9   : > { %p1033_p4 = por %p1262_p1, %p42_p0  ;;  %p163_p7 = scmp.lt.s32.totalorder %s961_s21, 3 }
   0xa   : > { %p1038_p6 = por %p156_p3, %p42_p0  ;;  %s963_s27 = smov [#allocation5]  }
   0xb   : > { %s1265_s24 = scalar_select %p1033_p4, 1, 0 }
   0xc   : > { %s1266_s25 = scalar_select %p1038_p6, 1, 0 }
   0xd   : > { %p1043_p8 = pnand %p619_p5, %p163_p7  ;;  %s175_s28 = sshll.u32 %s963_s27, 4  ;;  %s1047_s28 = int_to_ptr.vmem [resolvable:$true] %s175_s28 }
   0xe   : > { %s964_s30 = smov [#allocation7]   ;;  %s805_s9 = scalar_lea.hbm %s1257_s1, 1024 }
   0xf   : > { %p727_p9 = pneg %p1043_p8  ;;  %s191_s6 = sshll.u32 %s964_s30, 4  ;;  %s1058_s6 = int_to_ptr.vmem [resolvable:$true] %s191_s6 }
  0x10   : > { %p806_p12 = scmp.ne.s32.totalorder %s1257_s1, %s805_s9  ;;  %p812_p5 = scmp.lt.u32.totalorder %s805_s9, %s1257_s1 }
  0x11   : > { %p1054_p11 = pnand %p727_p9, %p1262_p1 }
  0x13   : > { %p807_p13 = pneg %p1054_p11 }
  0x15   : > { %p808_p0 = pnand %p807_p13, %p806_p12 }
  0x17   : > { %p809_p3 = pneg %p808_p0 }
  0x19   : > { %p814_p7 = pnand %p812_p5, %p809_p3 }
  0x1b   : > { %817 = shalt.err (!%p814_p7)
}
  0x1c   : > { %s818_s14 = scalar_lea.vmem %s1047_s28, 1024  ;;  %p826_p2 = scmp.lt.s32.totalorder %s1047_s28, %s1047_s28 }
  0x1d   : > { %p819_p9 = scmp.ne.s32.totalorder %s1047_s28, %s818_s14  ;;  %p827_p12 = scmp.lt.s32.totalorder %s818_s14, %s818_s14 }
  0x1f   : > { %p821_p10 = pnand %p819_p9, %p807_p13  ;;  %p828_p0 = por %p827_p12, %p826_p2 }
  0x21   : > { %p822_p1 = pneg %p821_p10 }
  0x23   : > { %p829_p6 = pnand %p828_p0, %p822_p1 }
  0x25   : > { %832 = shalt.err (!%p829_p6)
}
  0x26   : > { %s965_s15 = smov 64   ;;  %s966_s16 = smov 4  }
  0x27   : > { %730 = dma.hbm_to_vmem [thread:$0]  (!%p1054_p11), %s1257_s1, 1024, %s1047_s28, [#allocation6], %s965_s15, %s965_s15, %s966_s16  }
  0x28   : > { %s833_s7 = scalar_lea.hbm %s1259_s3, 1024 }
  0x29   : > { %p834_p1 = scmp.ne.s32.totalorder %s1259_s3, %s833_s7  ;;  %p840_p10 = scmp.lt.u32.totalorder %s833_s7, %s1259_s3 }
  0x2b   : > { %p836_p2 = pnand %p834_p1, %p807_p13 }
  0x2d   : > { %p837_p6 = pneg %p836_p2 }
  0x2f   : > { %p842_p3 = pnand %p840_p10, %p837_p6 }
  0x31   : > { %845 = shalt.err (!%p842_p3)
}
  0x32   : > { %s846_s28 = scalar_lea.vmem %s1058_s6, 1024  ;;  %p854_p12 = scmp.lt.s32.totalorder %s1058_s6, %s1058_s6 }
  0x33   : > { %p847_p5 = scmp.ne.s32.totalorder %s1058_s6, %s846_s28  ;;  %p855_p0 = scmp.lt.s32.totalorder %s846_s28, %s846_s28 }
  0x35   : > { %p849_p7 = pnand %p847_p5, %p807_p13  ;;  %p856_p1 = por %p855_p0, %p854_p12 }
  0x37   : > { %p850_p9 = pneg %p849_p7 }
  0x39   : > { %p857_p2 = pnand %p856_p1, %p850_p9 }
  0x3b   : > { %860 = shalt.err (!%p857_p2)
}
  0x3c   : > { %733 = dma.hbm_to_vmem [thread:$0]  (!%p1054_p11), %s1259_s3, 1024, %s1058_s6, [#allocation6], %s965_s15, %s965_s15, %s966_s16  }
  0x3d   : > { %s1119_s29 = sadd.s32 1, %s961_s21   ;;  %s29_s14 = sadd.s32 1, %s957_s20 }
  0x3e   : > { %s26_s17 = ssub.s32 %s961_s21, %s1119_s29  ;;  %p36_p13 = scmp.ne.s32.totalorder %s957_s20, %s953_s19 }
  0x3f   : > { %p27_p6 = scmp.eq.s32.totalorder %s26_s17, 0  ;;  %p37_p10 = scmp.eq.s32.totalorder %s961_s21, 0 }
  0x40   : > { %p1269_p3 = scmp.eq.s32.totalorder %s1024_s22, 1  ;;  %p744_p7 = scmp.lt.s32.totalorder %s961_s21, 2 }
  0x41   : > { %s1135_s27 = scalar_select %p27_p6, %s957_s20, %s29_s14  }
  0x42   : > { %p1129_p5 = por %p1269_p3, %p36_p13  ;;  %p38_p9 = por %p37_p10, %p36_p13 }
  0x43   : > { %s208_s30 = sand.u32 1, %s957_s20   ;;  %s655_s6 = sshll.u32 %s961_s21, 7 }
  0x44   : > { %s1270_s23 = scalar_select %p1129_p5, 1, 0 }
  0x45   : > { %s623_s7 = sshll.u32 %s208_s30, 3  ;;  %s1142_s10 = scalar_lea.hbm %s1256_s0, %s655_s6 }
  0x46   : > { %s212_s11 = scalar_lea.vmem [#allocation2], %s623_s7  ;;  %p1146_p11 = pnand %p744_p7, %p38_p9 }
  0x47   : > { %s219_s28 = sshll.u32 %s212_s11, 4  ;;  %s1150_s13 = scalar_lea.sflag [#allocation3], %s208_s30  ;;  %s1144_s28 = int_to_ptr.vmem [resolvable:$true] %s219_s28 }
  0x48   : > { %s861_s14 = scalar_lea.hbm %s1142_s10, 128  ;;  %p863_p0 = pneg %p1146_p11 }
  0x49   : > { %p862_p12 = scmp.ne.s32.totalorder %s1142_s10, %s861_s14  ;;  %s866_s6 = scalar_lea.hbm %s1256_s0, 256 }
  0x4a   : > { %p867_p13 = scmp.lt.u32.totalorder %s1142_s10, %s1256_s0  ;;  %p868_p6 = scmp.lt.u32.totalorder %s866_s6, %s861_s14 }
  0x4b   : > { %p864_p1 = pnand %p863_p0, %p862_p12  ;;  %p870_p3 = scmp.lt.u32.totalorder %s861_s14, %s1142_s10 }
  0x4c   : > { %p869_p10 = por %p868_p6, %p867_p13 }
  0x4d   : > { %p865_p2 = pneg %p864_p1 }
  0x4e   : > { %p871_p7 = por %p870_p3, %p869_p10 }
  0x50   : > { %p872_p9 = pnand %p871_p7, %p865_p2 }
  0x52   : > { %875 = shalt.err (!%p872_p9)
}
  0x53   : > { %s876_s30 = scalar_lea.vmem %s1144_s28, 128  ;;  %s967_s11 = smov [#allocation2]  }
  0x54   : > { %p877_p12 = scmp.ne.s32.totalorder %s1144_s28, %s876_s30  ;;  %s881_s17 = sshll.u32 %s967_s11, 4  ;;  %s882_s17 = int_to_ptr.vmem [resolvable:$false] %s881_s17 }
  0x55   : > { %s883_s7 = scalar_lea.vmem %s882_s17, 256  ;;  %p884_p4 = scmp.lt.s32.totalorder %s1144_s28, %s882_s17 }
  0x56   : > { %p879_p1 = pnand %p877_p12, %p863_p0  ;;  %p885_p13 = scmp.lt.s32.totalorder %s883_s7, %s876_s30 }
  0x58   : > { %p880_p5 = pneg %p879_p1  ;;  %p886_p6 = por %p885_p13, %p884_p4 }
  0x5a   : > { %p887_p10 = pnand %p886_p6, %p880_p5 }
  0x5c   : > { %890 = shalt.err (!%p887_p10)
}
  0x5d   : > { %737 = dma.hbm_to_vmem [thread:$0]  (!%p1146_p11), %s1142_s10, 128, %s1144_s28, %s1150_s13, %s965_s15, %s965_s15, %s966_s16  }
  0x5e   : > { %231 = sbr.rel (%p1043_p8) target bundleno = 590 (0x24e), region = 40  ;;  %s1184_s14 = sand.u32 (!%p1043_p8), 1, %s953_s19  }
  0x5f   : > { %s627_s6 = sshll.u32 (!%p1043_p8), %s1184_s14, 3  ;;  %s234_s8 = scalar_lea.sflag (!%p1043_p8), [#allocation3], %s1184_s14 }
  0x60   : > { %s1188_s9 = scalar_lea.vmem (!%p1043_p8), [#allocation2], %s627_s6  ;;  %p1272_p4 = scmp.ne.s32.totalorder (!%p1043_p8), %s1265_s24, 0 }
  0x65   : > { %936 = dma.done.wait (%p1272_p4), %s234_s8, 128  }
  0x66   : > { %938 = vsyncadd (%p1272_p4), %s234_s8, 4294967168  ;;  %p1273_p5 = scmp.eq.s32.totalorder %s1024_s22, 0 }
  0x68   : > { %940 = dma.done.wait (%p1273_p5), [#allocation6], 2048   ;;  %p1274_p8 = pmov %p1273_p5 }
  0x69   : > { %v968_v0 = vmov 0.0   ;;  %vm969_vm0 = vmmov 0   ;;  %v788_v1 = vld [vmem:[#allocation5] sm:$0xff]   ;;  %v789_v2 = vld [vmem:[#allocation5 + $0x8] sm:$0xff]   ;;  %v790_v3 = vld [vmem:[#allocation5 + $0x10] sm:$0xff]   ;;  %s630_s15 = sshll.u32 %s1184_s14, 4 }
  0x6a   : > { %942 = vsyncadd (%p1274_p8), [#allocation6], 4294965248  ;;  %675 = vmatprep.subr.bf16.mxu0 %v968_v0  ;;  %691 = vmatprep.mubr.msk.bf16.mxu0 %vm969_vm0, %v968_v0  ;;  %v797_v4 = vld [vmem:[#allocation7] sm:$0xff]   ;;  %v791_v5 = vld [vmem:[#allocation5 + $0x18] sm:$0xff]   ;;  %s271_s28 = scalar_lea.vmem [#allocation8], %s630_s15  ;;  %s656_s13 = sshll.u32 %s1024_s22, 8 }
  0x6b   : > { %695 = vmatprep.subr.bf16.mxu1 %v968_v0  ;;  %711 = vmatprep.mubr.msk.bf16.mxu1 %vm969_vm0, %v968_v0  ;;  %v798_v6 = vld [vmem:[#allocation7 + $0x8] sm:$0xff]   ;;  %v792_v7 = vld [vmem:[#allocation5 + $0x20] sm:$0xff]   ;;  %v799_v8 = vld [vmem:[#allocation7 + $0x10] sm:$0xff]   ;;  %s526_s12 = sshll.u32 %s271_s28, 4  ;;  %s1212_s17 = scalar_lea.hbm %s1261_s5, %s656_s13  ;;  %s1207_s12 = int_to_ptr.vmem [resolvable:$true] %s526_s12 }
  0x6c   : > { %676 = vmatpush3.bf16.msra.mxu0 %v788_v1  ;;  %696 = vmatpush3.bf16.msra.mxu1 %v797_v4  ;;  %v793_v9 = vld [vmem:[#allocation5 + $0x28] sm:$0xff]   ;;  %v800_v10 = vld [vmem:[#allocation7 + $0x18] sm:$0xff]   ;;  %v794_v11 = vld [vmem:[#allocation5 + $0x30] sm:$0xff]   ;;  %s513_s7 = scalar_lea.sflag [#allocation4], %s1184_s14  ;;  %s891_s22 = scalar_lea.vmem %s1207_s12, 256 }
  0x6d   : > { %677 = vmatprep.subr.bf16.mxu0 %v968_v0  ;;  %697 = vmatprep.subr.bf16.mxu1 %v968_v0  ;;  %v801_v12 = vld [vmem:[#allocation7 + $0x20] sm:$0xff]   ;;  %v795_v13 = vld [vmem:[#allocation5 + $0x38] sm:$0xff]   ;;  %v802_v14 = vld [vmem:[#allocation7 + $0x28] sm:$0xff]   ;;  %p892_p11 = scmp.ne.s32.totalorder %s1207_s12, %s891_s22  ;;  %p1275_p0 = scmp.ne.s32.totalorder %s1270_s23, 0 }
  0x6e   : > { %v796_v15 = vld [vmem:[%s1188_s9] sm:$0xff]   ;;  %s970_s6 = smov [#allocation8]  }
  0x6f   : > { %v803_v16 = vld [vmem:[#allocation7 + $0x30] sm:$0xff]   ;;  %v804_v17 = vld [vmem:[#allocation7 + $0x38] sm:$0xff]   ;;  %p893_p2 = pnand %p892_p11, %p1275_p0  ;;  %s895_s8 = sshll.u32 %s970_s6, 4  ;;  %s896_s8 = int_to_ptr.vmem [resolvable:$false] %s895_s8 }
  0x70   : > { %678 = vmatpush3.bf16.msra.mxu0 %v789_v2  ;;  %698 = vmatpush3.bf16.msra.mxu1 %v798_v6  ;;  %v631_v18 = vld [vmem:[%s1258_s2] ss:$0 sm:$0xff]  ;;  %s897_s9 = scalar_lea.vmem %s896_s8, 512  ;;  %p898_p7 = scmp.lt.s32.totalorder %s1207_s12, %s896_s8 }
  0x71   : > { %679 = vmatprep.subr.bf16.mxu0 %v968_v0  ;;  %699 = vmatprep.subr.bf16.mxu1 %v968_v0  ;;  %v641_v28 = vld [vmem:[%s1260_s4] ss:$0 sm:$0xff]  ;;  %p894_p3 = pneg %p893_p2  ;;  %p899_p9 = scmp.lt.s32.totalorder %s897_s9, %s891_s22 }
  0x73   : > { %p900_p12 = por %p899_p9, %p898_p7 }
  0x74   : > { %680 = vmatpush3.bf16.msra.mxu0 %v790_v3  ;;  %700 = vmatpush3.bf16.msra.mxu1 %v799_v8 }
  0x75   : > { %681 = vmatprep.subr.bf16.mxu0 %v968_v0  ;;  %701 = vmatprep.subr.bf16.mxu1 %v968_v0  ;;  %p901_p1 = pnand %p900_p12, %p894_p3 }
  0x78   : > { %682 = vmatpush3.bf16.msra.mxu0 %v791_v5  ;;  %702 = vmatpush3.bf16.msra.mxu1 %v800_v10 }
  0x79   : > { %683 = vmatprep.subr.bf16.mxu0 %v968_v0  ;;  %703 = vmatprep.subr.bf16.mxu1 %v968_v0 }
  0x7c   : > { %684 = vmatpush3.bf16.msra.mxu0 %v792_v7  ;;  %704 = vmatpush3.bf16.msra.mxu1 %v801_v12 }
  0x7d   : > { %685 = vmatprep.subr.bf16.mxu0 %v968_v0  ;;  %705 = vmatprep.subr.bf16.mxu1 %v968_v0 }
  0x80   : > { %686 = vmatpush3.bf16.msra.mxu0 %v793_v9  ;;  %706 = vmatpush3.bf16.msra.mxu1 %v802_v14 }
  0x81   : > { %687 = vmatprep.subr.bf16.mxu0 %v968_v0  ;;  %707 = vmatprep.subr.bf16.mxu1 %v968_v0 }
  0x84   : > { %688 = vmatpush3.bf16.msra.mxu0 %v794_v11  ;;  %708 = vmatpush3.bf16.msra.mxu1 %v803_v16 }
  0x85   : > { %689 = vmatprep.subr.bf16.mxu0 %v968_v0  ;;  %709 = vmatprep.subr.bf16.mxu1 %v968_v0 }
  0x88   : > { %690 = vmatpush3.bf16.msra.mxu0 %v795_v13  ;;  %710 = vmatpush3.bf16.msra.mxu1 %v804_v17 }
  0x8b   : > { %692 = vmatmul.mubr.bf16.vlgmr.msra.gmra.mrb[0].mxu0 %v796_v15 }
 0x15e   : > { %v388_v19 = vpop.f32.mrb[0].mxu0 }
 0x15f   : > { %v389_v20 = vadd.f32 %v631_v18, %v388_v19  ;;  %v693_v21 = vpop.f32.mrb[1].mxu0 }
 0x160   : > { %v391_v22 = vpop.f32.mrb[2].mxu0 }
 0x161   : > { %v392_v23 = vadd.f32 %v631_v18, %v391_v22  ;;  %v694_v24 = vpop.f32.mrb[3].mxu0  ;;  %v395_v25 = vmax.f32 %v389_v20, 0.0 }
 0x163   : > { %v396_v26 = vmax.f32 %v392_v23, 0.0 }
 0x165   : > { %v397_v27 = vpack.c.bf16 %v396_v26, %v395_v25 }
 0x167   : > { %712 = vmatmul.mubr.bf16.vlgmr.msra.gmra.mrb[0].mxu1 %v397_v27 }
 0x23a   : > { %v503_v29 = vpop.f32.mrb[0].mxu1 }
 0x23b   : > { %v504_v30 = vadd.f32 %v641_v28, %v503_v29  ;;  %v713_v31 = vpop.f32.mrb[1].mxu1 }
 0x23c   : > { %v506_v32 = vpop.f32.mrb[2].mxu1 }
 0x23d   : > { %510 = vst [vmem:[%s271_s28] sm:$0xff] %v504_v30  ;;  %v507_v33 = vadd.f32 %v641_v28, %v506_v32  ;;  %v714_v34 = vpop.f32.mrb[3].mxu1 }
 0x23f   : > { %511 = vst [vmem:[%s271_s28 + $0x8] sm:$0xff] %v507_v33 }
 0x240   : > { %904 = shalt.err (!%p901_p1)
}
 0x241   : > { %s905_s24 = scalar_lea.hbm %s1212_s17, 256  ;;  %s909_s16 = scalar_lea.hbm %s1261_s5, 512 }
 0x242   : > { %p906_p13 = scmp.ne.s32.totalorder %s1212_s17, %s905_s24  ;;  %p910_p4 = scmp.lt.u32.totalorder %s1212_s17, %s1261_s5 }
 0x243   : > { %p911_p5 = scmp.lt.u32.totalorder %s909_s16, %s905_s24  ;;  %p913_p11 = scmp.lt.u32.totalorder %s905_s24, %s1212_s17 }
 0x244   : > { %p907_p6 = pnand %p906_p13, %p1275_p0 }
 0x245   : > { %p912_p8 = por %p911_p5, %p910_p4 }
 0x246   : > { %p908_p10 = pneg %p907_p6 }
 0x247   : > { %p914_p2 = por %p913_p11, %p912_p8 }
 0x249   : > { %p915_p3 = pnand %p914_p2, %p908_p10 }
 0x24b   : > { %918 = shalt.err (!%p915_p3)
}
 0x24c   : > { %s971_s13 = smov 128   ;;  %s972_s30 = smov 8  }
 0x24d   : > { %725 = dma.vmem_to_hbm [thread:$0]  (%p1275_p0), %s1207_s12, 256, %s1212_s17, %s513_s7, %s971_s13, %s971_s13, %s972_s30  }
 0x24e PF: > { %s541_s11 = sand.u32 1, %s949_s18   ;;  %p1276_p7 = scmp.ne.s32.totalorder %s1266_s25, 0 }
 0x24f   : > { %p1277_p9 = scmp.ge.s32.totalorder %s961_s21, 2  ;;  %s542_s22 = scalar_lea.sflag [#allocation4], %s541_s11 }
 0x251   : > { %p739_p12 = pnand %p1277_p9, %p1276_p7 }
 0x253   : > { %944 = dma.done.wait (!%p739_p12), %s542_s22, 256  }
 0x254   : > { %946 = vsyncadd (!%p739_p12), %s542_s22, 4294967040  ;;  %p19_p1 = scmp.ge.s32.totalorder %s1119_s29, 4   ;;  %s1278_s18 = smov %s953_s19 }
 0x255   : > { %s1279_s19 = smov %s957_s20  ;;  %s1280_s20 = smov %s1135_s27 }
 0x256   : > { %s1281_s21 = smov %s1119_s29  ;;  %21 = sbr.rel (!%p19_p1) target bundleno = 6 (0x6), region = 93 }
 0x25d   :  { %547 = vsyncpa [#allocation3], 1 }
 0x25e   :  { %549 = vsyncpa [#allocation3 + $0x1], 1 }
 0x25f   :  { %550 = vsyncpa [#allocation6], 1 }
 0x260   :  { %551 = vsyncpa [#allocation4], 1 }
 0x261   :  { %553 = vsyncpa [#allocation4 + $0x1], 1 }

</bundles_post_ra>
